<compile_context>
chip_gen: v7x
topology: tpu7x:2x2x1
jax: 0.10.0
libtpu: 0.0.40
codegen_flags: <defaults>
</compile_context>

<pallas_src>
import functools

import jax
import jax.numpy as jnp
from jax.experimental import pallas as pl
from jax.experimental.pallas import tpu as pltpu

LANE = 128
SUBLANE = 8
DEFAULT_TILE_B = 1024  # raise to 2048-4096 on v7x for very large batches


def _round_up(x, m):
    return ((x + m - 1) // m) * m


# --------------------------------------------------------------------------
# Kernel body
# --------------------------------------------------------------------------
def _policy_kernel(x_ref, w1_ref, b1_ref, w2_ref, b2_ref, w3_ref, b3_ref,
                   out_ref, *, matmul_dtype):
    dt = matmul_dtype

    x = x_ref[...].astype(dt)

    # Layer 1: Linear + ReLU  (MXU matmul, f32 accumulation, f32 bias)
    h1 = jnp.dot(x, w1_ref[...], preferred_element_type=jnp.float32) + b1_ref[...]
    h1 = jnp.maximum(h1, 0.0)

    # Layer 2: Linear + ReLU
    h2 = jnp.dot(h1.astype(dt), w2_ref[...],
                 preferred_element_type=jnp.float32) + b2_ref[...]
    h2 = jnp.maximum(h2, 0.0)

    # Layer 3: Linear (logits, lane-padded to 128; padded bias cols = -1e30)
    logits = jnp.dot(h2.astype(dt), w3_ref[...],
                     preferred_element_type=jnp.float32) + b3_ref[...]

    # Numerically stable softmax over the feature (lane) axis.
    m = jnp.max(logits, axis=1, keepdims=True)
    e = jnp.exp(logits - m)                 # padded cols underflow to exactly 0
    denom = jnp.sum(e, axis=1, keepdims=True)
    inv = 1.0 / denom                       # exact recip on a (tile,1) vector
    out_ref[...] = (e * inv).astype(out_ref.dtype)


# --------------------------------------------------------------------------
# One-time parameter preparation (pad + cast). Call once, reuse every step.
# --------------------------------------------------------------------------
def prepare_params(params, *, matmul_dtype=jnp.bfloat16):
    """Pad weights/biases to lane-dense (128-multiple) shapes and pre-cast
    matmul operands. Returns (prepared_params, meta)."""
    w1, b1, w2, b2, w3, b3 = params
    in_dims, hid = w1.shape
    out_dims = w3.shape[1]

    in_p = _round_up(in_dims, LANE)
    hid_p = _round_up(hid, LANE)
    out_p = _round_up(out_dims, LANE)

    w1_p = (jnp.zeros((in_p, hid_p), jnp.float32)
            .at[:in_dims, :hid].set(w1).astype(matmul_dtype))
    w2_p = (jnp.zeros((hid_p, hid_p), jnp.float32)
            .at[:hid, :hid].set(w2).astype(matmul_dtype))
    w3_p = (jnp.zeros((hid_p, out_p), jnp.float32)
            .at[:hid, :out_dims].set(w3).astype(matmul_dtype))

    b1_p = jnp.zeros((1, hid_p), jnp.float32).at[:, :hid].set(b1.reshape(1, -1))
    b2_p = jnp.zeros((1, hid_p), jnp.float32).at[:, :hid].set(b2.reshape(1, -1))
    # Padded logit columns must softmax to 0 => large negative f32 bias.
    b3_p = (jnp.full((1, out_p), -1e30, jnp.float32)
            .at[:, :out_dims].set(b3.reshape(1, -1)))

    prepared = (w1_p, b1_p, w2_p, b2_p, w3_p, b3_p)
    meta = dict(in_dims=in_dims, hid=hid, out_dims=out_dims,
                in_p=in_p, hid_p=hid_p, out_p=out_p,
                matmul_dtype=matmul_dtype)
    return prepared, meta


def _const_spec(shape, mode=None):
    """Constant-index (VMEM-resident) BlockSpec, optionally single-buffered."""
    if mode is None:
        return pl.BlockSpec(shape, lambda i: (0, 0))
    return pl.BlockSpec(shape, lambda i: (0, 0), pipeline_mode=mode)


# --------------------------------------------------------------------------
# Forward pass
# --------------------------------------------------------------------------
def policy_network_forward(state, prepared, meta, *, tile_b=DEFAULT_TILE_B,
                           out_dtype=jnp.float32):
    """state: [B, input_dims] f32 -> probs: [B, output_dims] out_dtype."""
    w1_p, b1_p, w2_p, b2_p, w3_p, b3_p = prepared
    B, in_dims = state.shape
    assert in_dims == meta["in_dims"]
    in_p, hid_p, out_p = meta["in_p"], meta["hid_p"], meta["out_p"]
    out_dims = meta["out_dims"]
    mdt = meta["matmul_dtype"]

    # Batch padding: only to the sublane multiple (<= 7 rows), never to tile.
    b_pad = _round_up(B, SUBLANE)

    # Tile choice: >= 2 balanced grid steps when possible (v7x megacore),
    # capped at tile_b rows per step.
    n_steps = max(2, pl.cdiv(b_pad, tile_b)) if b_pad > SUBLANE else 1
    tile = _round_up(pl.cdiv(b_pad, n_steps), SUBLANE)
    grid = (pl.cdiv(b_pad, tile),)

    if b_pad != B or in_p != in_dims:
        # Tiny pad: <= 7 rows + feature-lane remainder. No copy when aligned.
        state_p = jnp.pad(state, ((0, b_pad - B), (0, in_p - in_dims)))
    else:
        state_p = state

    # Single-buffer the resident weights only when they are large (saves VMEM
    # under v7x's 64 MiB ceiling); small weights keep the default pipelining.
    w_itemsize = jnp.dtype(mdt).itemsize
    w_elems = in_p * hid_p + hid_p * hid_p + hid_p * out_p
    weight_mode = pl.Buffered(1) if w_elems * w_itemsize > (8 << 20) else None
    n_wbuf = 1 if weight_mode is not None else 2

    # VMEM limit derived from the actual footprint (with 2x margin).
    out_itemsize = jnp.dtype(out_dtype).itemsize
    est = (n_wbuf * w_itemsize * w_elems                       # weights
           + 2 * 4 * (2 * hid_p + out_p)                       # biases (f32)
           + 2 * tile * (in_p * 4 + out_p * out_itemsize)      # streamed tiles
           + 6 * tile * max(hid_p, out_p) * 4)                 # intermediates
    vmem_limit = int(min(max(2 * est, 16 << 20), 64 << 20))

    kernel = functools.partial(_policy_kernel, matmul_dtype=mdt)

    probs_full = pl.pallas_call(
        kernel,
        out_shape=jax.ShapeDtypeStruct((b_pad, out_p), out_dtype),
        grid=grid,
        in_specs=[
            pl.BlockSpec((tile, in_p), lambda i: (i, 0)),      # state: streamed
            _const_spec((in_p, hid_p), weight_mode),           # w1: resident
            _const_spec((1, hid_p)),                           # b1
            _const_spec((hid_p, hid_p), weight_mode),          # w2
            _const_spec((1, hid_p)),                           # b2
            _const_spec((hid_p, out_p), weight_mode),          # w3
            _const_spec((1, out_p)),                           # b3
        ],
        out_specs=pl.BlockSpec((tile, out_p), lambda i: (i, 0)),
        compiler_params=pltpu.CompilerParams(
            dimension_semantics=("parallel",),
            vmem_limit_bytes=vmem_limit,
        ),
    )(state_p, w1_p, b1_p, w2_p, b2_p, w3_p, b3_p)

    # Strip batch and lane padding (padded prob columns are exactly 0).
    return probs_full[:B, :out_dims]


# --------------------------------------------------------------------------
# Init + pure-JAX reference
# --------------------------------------------------------------------------
def init_params(key, input_dims, output_dims, hidden_dims=128):
    """torch.nn.Linear-style init U(-1/sqrt(fan_in), 1/sqrt(fan_in)).
    Weights stored [in, out] (transpose of PyTorch's [out, in])."""
    ks = jax.random.split(key, 6)

    def linear(kw, kb, fan_in, fan_out):
        bound = 1.0 / jnp.sqrt(jnp.float32(fan_in))
        w = jax.random.uniform(kw, (fan_in, fan_out), jnp.float32, -bound, bound)
        b = jax.random.uniform(kb, (1, fan_out), jnp.float32, -bound, bound)
        return w, b

    w1, b1 = linear(ks[0], ks[1], input_dims, hidden_dims)
    w2, b2 = linear(ks[2], ks[3], hidden_dims, hidden_dims)
    w3, b3 = linear(ks[4], ks[5], hidden_dims, output_dims)
    return (w1, b1, w2, b2, w3, b3)


def reference_forward(state, params):
    w1, b1, w2, b2, w3, b3 = params
    h1 = jnp.maximum(state @ w1 + b1, 0.0)
    h2 = jnp.maximum(h1 @ w2 + b2, 0.0)
    logits = h2 @ w3 + b3
    return jax.nn.softmax(logits, axis=1)


# TODO(synk): get_action's host-side numpy categorical sampling / log-prob for
# autograd has no Pallas equivalent; only the forward pass is implemented.

if __name__ == "__main__":
    # Small CartPole-like config: 4 state dims, 2 actions, hidden=32, batch=2.
    B, input_dims, output_dims, hidden_dims = 2, 4, 2, 32

    key = jax.random.PRNGKey(0)
    k_state, k_params = jax.random.split(key)

    state = jax.random.normal(k_state, (B, input_dims), dtype=jnp.float32)
    params = init_params(k_params, input_dims, output_dims, hidden_dims)
    ref = reference_forward(state, params)

    # Default path: bf16 matmul operands (native MXU path on v6e/v7x),
    # f32 accumulation / biases / output. Prepared once, reused per call.
    prep_bf16, meta_bf16 = prepare_params(params, matmul_dtype=jnp.bfloat16)
    probs = policy_network_forward(state, prep_bf16, meta_bf16)
    probs = jax.block_until_ready(probs)

    assert probs.shape == (B, output_dims)
    assert jnp.allclose(probs, ref, atol=2e-2, rtol=2e-2)
    assert jnp.allclose(jnp.sum(probs, axis=1), jnp.ones((B,)), atol=1e-3)

    # f32-operand path for a tight numerical check.
    prep_f32, meta_f32 = prepare_params(params, matmul_dtype=jnp.float32)
    probs_f32 = jax.block_until_ready(
        policy_network_forward(state, prep_f32, meta_f32))
    assert jnp.allclose(probs_f32, ref, atol=2e-3, rtol=2e-3)
    assert jnp.allclose(jnp.sum(probs_f32, axis=1), jnp.ones((B,)), atol=1e-4)

    print("KERNEL_OK")
</pallas_src>

<mosaic_0001>
module attributes {stable_mosaic.version = 11 : i64} {
  func.func @_policy_kernel(%arg0: i32, %arg1: memref<8x128xf32, #tpu.memory_space<vmem>>, %arg2: memref<128x128xbf16, #tpu.memory_space<vmem>>, %arg3: memref<1x128xf32, #tpu.memory_space<vmem>>, %arg4: memref<128x128xbf16, #tpu.memory_space<vmem>>, %arg5: memref<1x128xf32, #tpu.memory_space<vmem>>, %arg6: memref<128x128xbf16, #tpu.memory_space<vmem>>, %arg7: memref<1x128xf32, #tpu.memory_space<vmem>>, %arg8: memref<8x128xf32, #tpu.memory_space<vmem>>) attributes {dimension_semantics = [#tpu.dimension_semantics<parallel>], iteration_bounds = array<i64: 1>, scalar_prefetch = 0 : i64, scratch_operands = 0 : i64, tpu.core_type = #tpu.core_type<tc>, window_params = [{transform_indices = @transform_0, window_bounds = array<i64: 8, 128>}, {pipeline_mode = #tpu.pipeline_mode<synchronous>, transform_indices = @transform_1, window_bounds = array<i64: 128, 128>}, {pipeline_mode = #tpu.pipeline_mode<synchronous>, transform_indices = @transform_2, window_bounds = array<i64: 1, 128>}, {pipeline_mode = #tpu.pipeline_mode<synchronous>, transform_indices = @transform_3, window_bounds = array<i64: 128, 128>}, {pipeline_mode = #tpu.pipeline_mode<synchronous>, transform_indices = @transform_4, window_bounds = array<i64: 1, 128>}, {pipeline_mode = #tpu.pipeline_mode<synchronous>, transform_indices = @transform_5, window_bounds = array<i64: 128, 128>}, {pipeline_mode = #tpu.pipeline_mode<synchronous>, transform_indices = @transform_6, window_bounds = array<i64: 1, 128>}, {transform_indices = @transform_7, window_bounds = array<i64: 8, 128>}]} {
    %c0 = arith.constant 0 : index
    %c0_0 = arith.constant 0 : index
    %0 = vector.load %arg1[%c0, %c0_0] : memref<8x128xf32, #tpu.memory_space<vmem>>, vector<8x128xf32>
    %1 = arith.truncf %0 : vector<8x128xf32> to vector<8x128xbf16>
    %c0_1 = arith.constant 0 : index
    %c0_2 = arith.constant 0 : index
    %2 = vector.load %arg2[%c0_1, %c0_2] : memref<128x128xbf16, #tpu.memory_space<vmem>>, vector<128x128xbf16>
    %cst = arith.constant dense<0.000000e+00> : vector<8x128xf32>
    %3 = tpu.matmul %1, %2, %cst {dimension_numbers = #tpu.dot_dimension_numbers<[1], [0], [0], [1], [0, 0, 1, 1], [], []>} : vector<8x128xbf16>, vector<128x128xbf16>, vector<8x128xf32> -> vector<8x128xf32>
    %c0_3 = arith.constant 0 : index
    %c0_4 = arith.constant 0 : index
    %4 = vector.load %arg3[%c0_3, %c0_4] : memref<1x128xf32, #tpu.memory_space<vmem>>, vector<1x128xf32>
    %5 = vector.broadcast %4 : vector<1x128xf32> to vector<8x128xf32>
    %6 = arith.addf %3, %5 : vector<8x128xf32>
    %cst_5 = arith.constant 0.000000e+00 : f32
    %7 = vector.broadcast %cst_5 : f32 to vector<8x128xf32>
    %8 = arith.maximumf %6, %7 : vector<8x128xf32>
    %9 = arith.truncf %8 : vector<8x128xf32> to vector<8x128xbf16>
    %c0_6 = arith.constant 0 : index
    %c0_7 = arith.constant 0 : index
    %10 = vector.load %arg4[%c0_6, %c0_7] : memref<128x128xbf16, #tpu.memory_space<vmem>>, vector<128x128xbf16>
    %cst_8 = arith.constant dense<0.000000e+00> : vector<8x128xf32>
    %11 = tpu.matmul %9, %10, %cst_8 {dimension_numbers = #tpu.dot_dimension_numbers<[1], [0], [0], [1], [0, 0, 1, 1], [], []>} : vector<8x128xbf16>, vector<128x128xbf16>, vector<8x128xf32> -> vector<8x128xf32>
    %c0_9 = arith.constant 0 : index
    %c0_10 = arith.constant 0 : index
    %12 = vector.load %arg5[%c0_9, %c0_10] : memref<1x128xf32, #tpu.memory_space<vmem>>, vector<1x128xf32>
    %13 = vector.broadcast %12 : vector<1x128xf32> to vector<8x128xf32>
    %14 = arith.addf %11, %13 : vector<8x128xf32>
    %cst_11 = arith.constant 0.000000e+00 : f32
    %15 = vector.broadcast %cst_11 : f32 to vector<8x128xf32>
    %16 = arith.maximumf %14, %15 : vector<8x128xf32>
    %17 = arith.truncf %16 : vector<8x128xf32> to vector<8x128xbf16>
    %c0_12 = arith.constant 0 : index
    %c0_13 = arith.constant 0 : index
    %18 = vector.load %arg6[%c0_12, %c0_13] : memref<128x128xbf16, #tpu.memory_space<vmem>>, vector<128x128xbf16>
    %cst_14 = arith.constant dense<0.000000e+00> : vector<8x128xf32>
    %19 = tpu.matmul %17, %18, %cst_14 {dimension_numbers = #tpu.dot_dimension_numbers<[1], [0], [0], [1], [0, 0, 1, 1], [], []>} : vector<8x128xbf16>, vector<128x128xbf16>, vector<8x128xf32> -> vector<8x128xf32>
    %c0_15 = arith.constant 0 : index
    %c0_16 = arith.constant 0 : index
    %20 = vector.load %arg7[%c0_15, %c0_16] : memref<1x128xf32, #tpu.memory_space<vmem>>, vector<1x128xf32>
    %21 = vector.broadcast %20 : vector<1x128xf32> to vector<8x128xf32>
    %22 = arith.addf %19, %21 : vector<8x128xf32>
    %cst_17 = arith.constant dense<0xFF800000> : vector<8xf32>
    %23 = vector.multi_reduction <maximumf>, %22, %cst_17 [1] : vector<8x128xf32> to vector<8xf32>
    %24 = vector.shape_cast %23 : vector<8xf32> to vector<8x1xf32>
    %25 = vector.broadcast %24 : vector<8x1xf32> to vector<8x128xf32>
    %26 = arith.subf %22, %25 : vector<8x128xf32>
    %27 = math.exp %26 : vector<8x128xf32>
    %cst_18 = arith.constant dense<0.000000e+00> : vector<8xf32>
    %28 = vector.multi_reduction <add>, %27, %cst_18 [1] : vector<8x128xf32> to vector<8xf32>
    %29 = vector.shape_cast %28 : vector<8xf32> to vector<8x1xf32>
    %cst_19 = arith.constant 1.000000e+00 : f32
    %30 = vector.broadcast %cst_19 : f32 to vector<8x1xf32>
    %31 = arith.divf %30, %29 : vector<8x1xf32>
    %32 = vector.broadcast %31 : vector<8x1xf32> to vector<8x128xf32>
    %33 = arith.mulf %27, %32 : vector<8x128xf32>
    %c0_20 = arith.constant 0 : index
    %c0_21 = arith.constant 0 : index
    %34 = vector.load %arg8[%c0_20, %c0_21] : memref<8x128xf32, #tpu.memory_space<vmem>>, vector<8x128xf32>
    tpu.vector_store %arg8[%c0_20, %c0_21], %33 {strides = array<i32>} : memref<8x128xf32, #tpu.memory_space<vmem>>, vector<8x128xf32>,
    return
  }
  func.func @transform_0(%arg0: i32) -> (i32, i32) {
    %c0_i32 = arith.constant 0 : i32
    %c0_i32_0 = arith.constant 0 : i32
    return %arg0, %c0_i32 : i32, i32
  }
  func.func @transform_1(%arg0: i32) -> (i32, i32) {
    %c0_i32 = arith.constant 0 : i32
    %c0_i32_0 = arith.constant 0 : i32
    %c0_i32_1 = arith.constant 0 : i32
    return %c0_i32, %c0_i32_0 : i32, i32
  }
  func.func @transform_2(%arg0: i32) -> (i32, i32) {
    %c0_i32 = arith.constant 0 : i32
    %c0_i32_0 = arith.constant 0 : i32
    %c0_i32_1 = arith.constant 0 : i32
    return %c0_i32, %c0_i32_0 : i32, i32
  }
  func.func @transform_3(%arg0: i32) -> (i32, i32) {
    %c0_i32 = arith.constant 0 : i32
    %c0_i32_0 = arith.constant 0 : i32
    %c0_i32_1 = arith.constant 0 : i32
    return %c0_i32, %c0_i32_0 : i32, i32
  }
  func.func @transform_4(%arg0: i32) -> (i32, i32) {
    %c0_i32 = arith.constant 0 : i32
    %c0_i32_0 = arith.constant 0 : i32
    %c0_i32_1 = arith.constant 0 : i32
    return %c0_i32, %c0_i32_0 : i32, i32
  }
  func.func @transform_5(%arg0: i32) -> (i32, i32) {
    %c0_i32 = arith.constant 0 : i32
    %c0_i32_0 = arith.constant 0 : i32
    %c0_i32_1 = arith.constant 0 : i32
    return %c0_i32, %c0_i32_0 : i32, i32
  }
  func.func @transform_6(%arg0: i32) -> (i32, i32) {
    %c0_i32 = arith.constant 0 : i32
    %c0_i32_0 = arith.constant 0 : i32
    %c0_i32_1 = arith.constant 0 : i32
    return %c0_i32, %c0_i32_0 : i32, i32
  }
  func.func @transform_7(%arg0: i32) -> (i32, i32) {
    %c0_i32 = arith.constant 0 : i32
    %c0_i32_0 = arith.constant 0 : i32
    return %arg0, %c0_i32 : i32, i32
  }
}

</mosaic_0001>

<bundles_post_ra>
// kernel: tpu_custom_call.1
= control target key start
LH: loop header
LB: loop body
LE: loop exit
PB: predicated region body
PF: predicated region fallthrough
CT: control target
= control target key end

     0   :  { %12 = vsyncpa [#allocation3], 0  ;;  %s874_s0 = inlined_call_operand.hbm [shape: f32[8,128], index: 0, kind: input, shape index: {}]   ;;  %s875_s1 = inlined_call_operand.hbm [shape: bf16[128,128], index: 1, kind: input, shape index: {}]   ;;  %s876_s2 = inlined_call_operand.vmem [shape: f32[1,128], index: 2, kind: input, shape index: {}]   ;;  %s877_s3 = inlined_call_operand.hbm [shape: bf16[128,128], index: 3, kind: input, shape index: {}]   ;;  %s878_s4 = inlined_call_operand.vmem [shape: f32[1,128], index: 4, kind: input, shape index: {}]   ;;  %s879_s5 = inlined_call_operand.hbm [shape: bf16[128,128], index: 5, kind: input, shape index: {}]   ;;  %s880_s6 = inlined_call_operand.vmem [shape: f32[1,128], index: 6, kind: input, shape index: {}]   ;;  %s881_s7 = inlined_call_operand.hbm [shape: f32[8,128], index: 7, kind: output, shape index: {}]  }
   0x1   :  { %13 = vsyncpa [#allocation6], 0 }
   0x2   :  { %14 = vsyncpa [#allocation9], 0 }
   0x3   :  { %15 = vsyncpa [#allocation4], 0  ;;  %s717_s24 = smov [#allocation5]   ;;  %s599_s28 = scalar_lea.hbm %s875_s1, 1024 }
   0x4   :  { %s31_s25 = sshll.u32 %s717_s24, 4  ;;  %p600_p0 = scmp.ne.s32.totalorder %s875_s1, %s599_s28  ;;  %s32_s25 = int_to_ptr.vmem [resolvable:$true] %s31_s25 }
   0x5   :  { %p603_p1 = scmp.lt.u32.totalorder %s599_s28, %s875_s1 }
   0x7   :  { %p605_p2 = pnand %p603_p1, %p600_p0 }
   0x9   :  { %608 = shalt.err (!%p605_p2)
}
   0xa   :  { %s609_s10 = scalar_lea.vmem %s32_s25, 1024  ;;  %p614_p4 = scmp.lt.s32.totalorder %s32_s25, %s32_s25 }
   0xb   :  { %p610_p3 = scmp.ne.s32.totalorder %s32_s25, %s609_s10  ;;  %p615_p5 = scmp.lt.s32.totalorder %s609_s10, %s609_s10 }
   0xd   :  { %p616_p6 = por %p615_p5, %p614_p4 }
   0xf   :  { %p617_p7 = pnand %p616_p6, %p610_p3 }
  0x11   :  { %620 = shalt.err (!%p617_p7)
}
  0x12   :  { %s718_s11 = smov 64   ;;  %s719_s12 = smov 4  }
  0x13   :  { %37 = dma.hbm_to_vmem [thread:$0]  %s875_s1, 1024, %s32_s25, [#allocation6], %s718_s11, %s718_s11, %s719_s12  }
  0x14   :  { %s720_s15 = smov [#allocation2]   ;;  %s721_s17 = smov [#allocation7]  }
  0x15   :  { %s22_s16 = sshll.u32 %s720_s15, 4  ;;  %s45_s18 = sshll.u32 %s721_s17, 4  ;;  %s23_s16 = int_to_ptr.vmem [resolvable:$true] %s22_s16  ;;  %s46_s18 = int_to_ptr.vmem [resolvable:$true] %s45_s18 }
  0x16   :  { %s621_s21 = scalar_lea.hbm %s874_s0, 128 }
  0x17   :  { %p622_p8 = scmp.ne.s32.totalorder %s874_s0, %s621_s21  ;;  %p625_p9 = scmp.lt.u32.totalorder %s621_s21, %s874_s0 }
  0x19   :  { %p627_p10 = pnand %p625_p9, %p622_p8 }
  0x1b   :  { %630 = shalt.err (!%p627_p10)
}
  0x1c   :  { %s631_s1 = scalar_lea.vmem %s23_s16, 128  ;;  %p636_p12 = scmp.lt.s32.totalorder %s23_s16, %s23_s16 }
  0x1d   :  { %p632_p11 = scmp.ne.s32.totalorder %s23_s16, %s631_s1  ;;  %p637_p13 = scmp.lt.s32.totalorder %s631_s1, %s631_s1 }
  0x1f   :  { %p638_p0 = por %p637_p13, %p636_p12 }
  0x21   :  { %p639_p1 = pnand %p638_p0, %p632_p11 }
  0x23   :  { %642 = shalt.err (!%p639_p1)
}
  0x24   :  { %25 = dma.hbm_to_vmem [thread:$0]  %s874_s0, 128, %s23_s16, [#allocation3]  }
  0x25   :  { %s643_s30 = scalar_lea.hbm %s877_s3, 1024 }
  0x26   :  { %p644_p2 = scmp.ne.s32.totalorder %s877_s3, %s643_s30  ;;  %p647_p3 = scmp.lt.u32.totalorder %s643_s30, %s877_s3 }
  0x28   :  { %p649_p4 = pnand %p647_p3, %p644_p2 }
  0x2a   :  { %652 = shalt.err (!%p649_p4)
}
  0x2b   :  { %s653_s14 = scalar_lea.vmem %s46_s18, 1024  ;;  %p658_p6 = scmp.lt.s32.totalorder %s46_s18, %s46_s18 }
  0x2c   :  { %p654_p5 = scmp.ne.s32.totalorder %s46_s18, %s653_s14  ;;  %p659_p7 = scmp.lt.s32.totalorder %s653_s14, %s653_s14 }
  0x2e   :  { %p660_p8 = por %p659_p7, %p658_p6 }
  0x30   :  { %p661_p9 = pnand %p660_p8, %p654_p5 }
  0x32   :  { %664 = shalt.err (!%p661_p9)
}
  0x33   :  { %51 = dma.hbm_to_vmem [thread:$0]  %s877_s3, 1024, %s46_s18, [#allocation6], %s718_s11, %s718_s11, %s719_s12  }
  0x34   :  { %s722_s16 = smov [#allocation8]   ;;  %s665_s21 = scalar_lea.hbm %s879_s5, 1024 }
  0x35   :  { %s59_s17 = sshll.u32 %s722_s16, 4  ;;  %p666_p10 = scmp.ne.s32.totalorder %s879_s5, %s665_s21  ;;  %s60_s17 = int_to_ptr.vmem [resolvable:$true] %s59_s17 }
  0x36   :  { %p669_p11 = scmp.lt.u32.totalorder %s665_s21, %s879_s5 }
  0x38   :  { %p671_p12 = pnand %p669_p11, %p666_p10 }
  0x3a   :  { %674 = shalt.err (!%p671_p12)
}
  0x3b   :  { %s675_s1 = scalar_lea.vmem %s60_s17, 1024  ;;  %p680_p0 = scmp.lt.s32.totalorder %s60_s17, %s60_s17 }
  0x3c   :  { %p676_p13 = scmp.ne.s32.totalorder %s60_s17, %s675_s1  ;;  %p681_p1 = scmp.lt.s32.totalorder %s675_s1, %s675_s1 }
  0x3e   :  { %p682_p2 = por %p681_p1, %p680_p0 }
  0x40   :  { %p683_p3 = pnand %p682_p2, %p676_p13 }
  0x42   :  { %686 = shalt.err (!%p683_p3)
}
  0x43   :  { %65 = dma.hbm_to_vmem [thread:$0]  %s879_s5, 1024, %s60_s17, [#allocation9], %s718_s11, %s718_s11, %s719_s12  }
  0x44   :  { %709 = dma.done.wait [#allocation3], 128  }
  0x45   :  { %710 = vsyncadd [#allocation3], 4294967168 }
  0x46   :  { %711 = dma.done.wait [#allocation6], 2048  }
  0x47   :  { %712 = vsyncadd [#allocation6], 4294965248 }
  0x48   :  { %713 = dma.done.wait [#allocation9], 1024  }
  0x49   :  { %714 = vsyncadd [#allocation9], 4294966272  ;;  %v723_v0 = vmov 0.0   ;;  %vm724_vm0 = vmmov 0   ;;  %v571_v1 = vld [vmem:[#allocation5] sm:$0xff]   ;;  %v572_v2 = vld [vmem:[#allocation5 + $0x8] sm:$0xff]  }
  0x4a   :  { %502 = vmatprep.subr.bf16.mxu0 %v723_v0  ;;  %518 = vmatprep.mubr.msk.bf16.mxu0 %vm724_vm0, %v723_v0  ;;  %v573_v3 = vld [vmem:[#allocation5 + $0x10] sm:$0xff]   ;;  %v579_v4 = vld [vmem:[#allocation7] sm:$0xff]   ;;  %v574_v5 = vld [vmem:[#allocation5 + $0x18] sm:$0xff]  }
  0x4b   :  { %522 = vmatprep.subr.bf16.mxu1 %v723_v0  ;;  %538 = vmatprep.mubr.msk.bf16.mxu1 %vm724_vm0, %v723_v0  ;;  %v580_v6 = vld [vmem:[#allocation7 + $0x8] sm:$0xff]   ;;  %v575_v7 = vld [vmem:[#allocation5 + $0x20] sm:$0xff]   ;;  %v581_v8 = vld [vmem:[#allocation7 + $0x10] sm:$0xff]  }
  0x4c   :  { %503 = vmatpush3.bf16.msra.mxu0 %v571_v1  ;;  %523 = vmatpush3.bf16.msra.mxu1 %v579_v4  ;;  %v576_v9 = vld [vmem:[#allocation5 + $0x28] sm:$0xff]   ;;  %v582_v10 = vld [vmem:[#allocation7 + $0x18] sm:$0xff]   ;;  %v577_v11 = vld [vmem:[#allocation5 + $0x30] sm:$0xff]  }
  0x4d   :  { %504 = vmatprep.subr.bf16.mxu0 %v723_v0  ;;  %524 = vmatprep.subr.bf16.mxu1 %v723_v0  ;;  %v583_v12 = vld [vmem:[#allocation7 + $0x20] sm:$0xff]   ;;  %v578_v13 = vld [vmem:[#allocation5 + $0x38] sm:$0xff]   ;;  %v584_v15 = vld [vmem:[#allocation7 + $0x28] sm:$0xff]  }
  0x4e   :  { %v81_v14 = vld [vmem:[#allocation2] sm:$0xff]  ;;  %v585_v17 = vld [vmem:[#allocation7 + $0x30] sm:$0xff]   ;;  %v587_v19 = vld [vmem:[#allocation8] sm:$0xff]  }
  0x4f   :  { %v82_v16 = vpack.c.bf16 %v81_v14, %v81_v14  ;;  %v586_v18 = vld [vmem:[#allocation7 + $0x38] sm:$0xff]   ;;  %v588_v20 = vld [vmem:[#allocation8 + $0x8] sm:$0xff]   ;;  %v589_v21 = vld [vmem:[#allocation8 + $0x10] sm:$0xff]  }
  0x50   :  { %505 = vmatpush3.bf16.msra.mxu0 %v572_v2  ;;  %525 = vmatpush3.bf16.msra.mxu1 %v580_v6  ;;  %v590_v22 = vld [vmem:[#allocation8 + $0x18] sm:$0xff]   ;;  %v591_v23 = vld [vmem:[#allocation8 + $0x20] sm:$0xff]   ;;  %v592_v24 = vld [vmem:[#allocation8 + $0x28] sm:$0xff]  }
  0x51   :  { %506 = vmatprep.subr.bf16.mxu0 %v723_v0  ;;  %526 = vmatprep.subr.bf16.mxu1 %v723_v0  ;;  %v448_v25 = vld [vmem:[%s876_s2] ss:$0 sm:$0xff]  ;;  %v593_v33 = vld [vmem:[#allocation8 + $0x30] sm:$0xff]  }
  0x52   :  { %v594_v34 = vld [vmem:[#allocation8 + $0x38] sm:$0xff]  }
  0x53   :  { %v457_v35 = vld [vmem:[%s878_s4] ss:$0 sm:$0xff]  ;;  %s725_s4 = smov [#allocation10]  }
  0x54   :  { %507 = vmatpush3.bf16.msra.mxu0 %v573_v3  ;;  %527 = vmatpush3.bf16.msra.mxu1 %v581_v8  ;;  %v466_v43 = vld [vmem:[%s880_s6] ss:$0 sm:$0xff]  ;;  %s437_s28 = sshll.u32 %s725_s4, 4  ;;  %s438_s28 = int_to_ptr.vmem [resolvable:$true] %s437_s28 }
  0x55   :  { %508 = vmatprep.subr.bf16.mxu0 %v723_v0  ;;  %528 = vmatprep.subr.bf16.mxu1 %v723_v0  ;;  %s687_s6 = scalar_lea.vmem %s438_s28, 128  ;;  %p692_p5 = scmp.lt.s32.totalorder %s438_s28, %s438_s28 }
  0x56   :  { %p688_p4 = scmp.ne.s32.totalorder %s438_s28, %s687_s6  ;;  %p693_p6 = scmp.lt.s32.totalorder %s687_s6, %s687_s6 }
  0x58   :  { %509 = vmatpush3.bf16.msra.mxu0 %v574_v5  ;;  %529 = vmatpush3.bf16.msra.mxu1 %v582_v10  ;;  %p694_p7 = por %p693_p6, %p692_p5 }
  0x59   :  { %510 = vmatprep.subr.bf16.mxu0 %v723_v0  ;;  %530 = vmatprep.subr.bf16.mxu1 %v723_v0 }
  0x5a   :  { %p695_p8 = pnand %p694_p7, %p688_p4 }
  0x5c   :  { %511 = vmatpush3.bf16.msra.mxu0 %v575_v7  ;;  %531 = vmatpush3.bf16.msra.mxu1 %v583_v12 }
  0x5d   :  { %512 = vmatprep.subr.bf16.mxu0 %v723_v0  ;;  %532 = vmatprep.subr.bf16.mxu1 %v723_v0 }
  0x60   :  { %513 = vmatpush3.bf16.msra.mxu0 %v576_v9  ;;  %533 = vmatpush3.bf16.msra.mxu1 %v584_v15 }
  0x61   :  { %514 = vmatprep.subr.bf16.mxu0 %v723_v0  ;;  %534 = vmatprep.subr.bf16.mxu1 %v723_v0 }
  0x64   :  { %515 = vmatpush3.bf16.msra.mxu0 %v577_v11  ;;  %535 = vmatpush3.bf16.msra.mxu1 %v585_v17 }
  0x65   :  { %516 = vmatprep.subr.bf16.mxu0 %v723_v0  ;;  %536 = vmatprep.subr.bf16.mxu1 %v723_v0 }
  0x68   :  { %517 = vmatpush3.bf16.msra.mxu0 %v578_v13  ;;  %537 = vmatpush3.bf16.msra.mxu1 %v586_v18 }
  0x69   :  { %542 = vmatprep.subr.bf16.mxu0 %v723_v0 }
  0x6b   :  { %519 = vmatmul.mubr.bf16.vlgmr.msra.gmra.mrb[0].mxu0 %v82_v16 }
  0x6c   :  { %558 = vmatprep.mubr.msk.bf16.mxu0 %vm724_vm0, %v723_v0  ;;  %543 = vmatpush3.bf16.msra.mxu0 %v587_v19 }
  0x6d   :  { %544 = vmatprep.subr.bf16.mxu0 %v723_v0 }
  0x70   :  { %545 = vmatpush3.bf16.msra.mxu0 %v588_v20 }
  0x71   :  { %546 = vmatprep.subr.bf16.mxu0 %v723_v0 }
  0x74   :  { %547 = vmatpush3.bf16.msra.mxu0 %v589_v21 }
  0x75   :  { %548 = vmatprep.subr.bf16.mxu0 %v723_v0 }
  0x78   :  { %549 = vmatpush3.bf16.msra.mxu0 %v590_v22 }
  0x79   :  { %550 = vmatprep.subr.bf16.mxu0 %v723_v0 }
  0x7c   :  { %551 = vmatpush3.bf16.msra.mxu0 %v591_v23 }
  0x7d   :  { %552 = vmatprep.subr.bf16.mxu0 %v723_v0 }
  0x80   :  { %553 = vmatpush3.bf16.msra.mxu0 %v592_v24 }
  0x81   :  { %554 = vmatprep.subr.bf16.mxu0 %v723_v0 }
  0x84   :  { %555 = vmatpush3.bf16.msra.mxu0 %v593_v33 }
  0x85   :  { %556 = vmatprep.subr.bf16.mxu0 %v723_v0 }
  0x88   :  { %557 = vmatpush3.bf16.msra.mxu0 %v594_v34 }
 0x13e   :  { %v188_v26 = vpop.f32.mrb[0].mxu0 }
 0x13f   :  { %v189_v27 = vadd.f32 %v448_v25, %v188_v26  ;;  %v520_v28 = vpop.f32.mrb[1].mxu0 }
 0x140   :  { %v191_v29 = vpop.f32.mrb[2].mxu0 }
 0x141   :  { %v194_v30 = vmax.f32 %v189_v27, 0.0  ;;  %v521_v31 = vpop.f32.mrb[3].mxu0 }
 0x143   :  { %v195_v32 = vpack.c.bf16 %v194_v30, %v194_v30 }
 0x145   :  { %539 = vmatmul.mubr.bf16.vlgmr.msra.gmra.mrb[0].mxu1 %v195_v32 }
 0x218   :  { %v301_v36 = vpop.f32.mrb[0].mxu1 }
 0x219   :  { %v302_v37 = vadd.f32 %v457_v35, %v301_v36  ;;  %v540_v38 = vpop.f32.mrb[1].mxu1 }
 0x21a   :  { %v304_v39 = vpop.f32.mrb[2].mxu1 }
 0x21b   :  { %v307_v40 = vmax.f32 %v302_v37, 0.0  ;;  %v541_v41 = vpop.f32.mrb[3].mxu1 }
 0x21d   :  { %v308_v42 = vpack.c.bf16 %v307_v40, %v307_v40 }
 0x21f   :  { %559 = vmatmul.mubr.bf16.vlgmr.msra.gmra.mrb[4].mxu0 %v308_v42 }
 0x2f2   :  { %v414_v44 = vpop.f32.mrb[4].mxu0 }
 0x2f3   :  { %v415_v45 = vadd.f32 %v466_v43, %v414_v44  ;;  %v560_v46 = vpop.f32.mrb[5].mxu0 }
 0x2f4   :  { %v417_v47 = vpop.f32.mrb[6].mxu0 }
 0x2f5   :  { %420 = vmax.xlane.f32.xlu0 %v415_v45  ;;  %v561_v48 = vpop.f32.mrb[7].mxu0 }
 0x382   :  { %v421_v49 = vpop.xlane.xlu0 %420 }
 0x383   :  { %v422_v50 = vsub.f32 %v415_v45, %v421_v49 }
 0x385   :  { %v423_v51 = vmul.f32 1.442695, %v422_v50 }
 0x387   :  { %595 = vpow2.f32 %v423_v51 }
 0x391   :  { %v596_v52 = vpop.eup %595 }
 0x392   :  { %425 = vadd.xlane.f32.xlu0 %v596_v52 }
 0x41f   :  { %v426_v53 = vpop.xlane.xlu0 %425 }
 0x420   :  { %597 = vrcp.f32 %v426_v53 }
 0x42a   :  { %v598_v54 = vpop.eup %597 }
 0x42b   :  { %v429_v55 = vmul.f32 %v598_v54, %v596_v52 }
 0x42d   :  { %430 = vst [vmem:[#allocation10] sm:$0xff] %v429_v55 }
 0x42e   :  { %698 = shalt.err (!%p695_p8)
}
 0x42f   :  { %s699_s8 = scalar_lea.hbm %s881_s7, 128 }
 0x430   :  { %p700_p9 = scmp.ne.s32.totalorder %s881_s7, %s699_s8  ;;  %p703_p10 = scmp.lt.u32.totalorder %s699_s8, %s881_s7 }
 0x432   :  { %p705_p11 = pnand %p703_p10, %p700_p9 }
 0x434   :  { %708 = shalt.err (!%p705_p11)
}
 0x435   :  { %440 = dma.vmem_to_hbm [thread:$0]  %s438_s28, 128, %s881_s7, [#allocation4]  }
 0x436   :  { %715 = dma.done.wait [#allocation4], 128  }
 0x437   :  { %716 = vsyncadd [#allocation4], 4294967168 }
 0x438   :  { %444 = vsyncpa [#allocation3], 1 }
 0x439   :  { %445 = vsyncpa [#allocation6], 1 }
 0x43a   :  { %446 = vsyncpa [#allocation9], 1 }
 0x43b   :  { %447 = vsyncpa [#allocation4], 1 }

</bundles_post_ra>
